<compile_context>
chip_gen: v7x
topology: tpu7x:2x2x1
jax: 0.10.0
libtpu: 0.0.40
codegen_flags: <defaults>
</compile_context>

<pallas_src>
import jax
import jax.numpy as jnp
from jax.experimental import pallas as pl
from jax.experimental.pallas import tpu as pltpu


def _round_up(n, m):
    return ((n + m - 1) // m) * m


def dqn_kernel(x_ref, w1_ref, b1_ref, w2_ref, b2_ref, w3_ref, b3_ref, out_ref):
    # Hoist bias loads once; keep them (1, H) so the broadcast rides the VPU add.
    b1 = b1_ref[...]
    b2 = b2_ref[...]
    b3 = b3_ref[...]

    # In-kernel cast of the streamed activations to the MXU weight dtype; the
    # VALU slots have slack (the MXU push slot is what saturates), and this
    # avoids an extra wrapper-side XLA pass over x.
    xw = x_ref[...].astype(w1_ref.dtype)

    # fc1 + ReLU   (bf16 MXU operands, f32 accumulation / elementwise)
    h1 = jnp.dot(xw, w1_ref[...], preferred_element_type=jnp.float32)
    h1 = jnp.maximum(h1 + b1, 0.0)

    # fc2 + ReLU
    h2 = jnp.dot(h1.astype(w2_ref.dtype), w2_ref[...],
                 preferred_element_type=jnp.float32)
    h2 = jnp.maximum(h2 + b2, 0.0)

    # fc3 (no activation); x.view(x.size(0), -1) is identity for 2-D input.
    # Output columns are zero-padded to 128 -> unmasked lane-dense store.
    # TODO(synk): fc3 (N<=4) could move off the MXU onto idle VPU/XLU slots
    # (broadcast-mul + cross-lane reduce); only after a bundle dump confirms
    # the vmatmul slot is binding.
    h3 = jnp.dot(h2.astype(w3_ref.dtype), w3_ref[...],
                 preferred_element_type=jnp.float32)
    out_ref[...] = (h3 + b3).astype(out_ref.dtype)


def prepare_params(params, weight_dtype=jnp.bfloat16):
    """Zero-pad hidden 200->256 and actions A->128 (lane-aligned); cast MXU weights."""
    w1, b1 = params["w1"], params["b1"]
    w2, b2 = params["w2"], params["b2"]
    w3, b3 = params["w3"], params["b3"]
    h = w1.shape[1]
    a = w3.shape[1]
    hp = _round_up(h, 128)          # 200 -> 256
    ap = _round_up(a, 128)          # 4   -> 128
    ph, pa = hp - h, ap - a
    return {
        "w1": jnp.pad(w1, ((0, 0), (0, ph))).astype(weight_dtype),
        "b1": jnp.pad(b1, ((0, 0), (0, ph))).astype(jnp.float32),
        "w2": jnp.pad(w2, ((0, ph), (0, ph))).astype(weight_dtype),
        "b2": jnp.pad(b2, ((0, 0), (0, ph))).astype(jnp.float32),
        "w3": jnp.pad(w3, ((0, ph), (0, pa))).astype(weight_dtype),
        "b3": jnp.pad(b3, ((0, 0), (0, pa))).astype(jnp.float32),
        "num_actions": a,
    }


def dqn_forward(x, p, tile_b=2048):
    """x: (B, 6*num_particles) float32. p: prepared (padded / casted) params."""
    B, in_dim = x.shape
    hp = p["w1"].shape[1]
    ap = p["w3"].shape[1]
    a = p["num_actions"]

    # Batch tile: large (amortizes ~0.35 us/step overhead and per-step MXU RHS
    # re-push of w1/w2/w3), multiple of 16 (bf16 sublane packing), and capped at
    # ceil(B/2) so nb >= 2 and the "parallel" axis can shard over v7x's 2 TCs.
    tb = min(tile_b, _round_up(pl.cdiv(B, 2), 16))
    bp = _round_up(B, tb)
    if bp != B:
        x = jnp.pad(x, ((0, bp - B), (0, 0)))
    nb = bp // tb

    def resident(shape):
        nd = len(shape)
        return pl.BlockSpec(shape, lambda i, _n=nd: (0,) * _n)

    weight_arrays = [p["w1"], p["b1"], p["w2"], p["b2"], p["w3"], p["b3"]]
    weight_bytes = sum(int(v.nbytes) for v in weight_arrays)
    cost = pl.CostEstimate(
        flops=2 * bp * (in_dim * hp + hp * hp + hp * ap),
        transcendentals=0,
        bytes_accessed=int(x.nbytes) + bp * ap * 4 + weight_bytes,
    )

    out = pl.pallas_call(
        dqn_kernel,
        out_shape=jax.ShapeDtypeStruct((bp, ap), jnp.float32),
        grid=(nb,),
        in_specs=[
            pl.BlockSpec((tb, in_dim), lambda i: (i, 0)),   # activations: pipelined
            resident(p["w1"].shape), resident(p["b1"].shape),
            resident(p["w2"].shape), resident(p["b2"].shape),
            resident(p["w3"].shape), resident(p["b3"].shape),
        ],
        out_specs=pl.BlockSpec((tb, ap), lambda i: (i, 0)),
        compiler_params=pltpu.CompilerParams(
            dimension_semantics=("parallel",),              # 2-TC sharding on v7x
            vmem_limit_bytes=32 * 1024 * 1024,              # headroom for big tiles
        ),
        cost_estimate=cost,
    )(x, p["w1"], p["b1"], p["w2"], p["b2"], p["w3"], p["b3"])

    return out[:B, :a]


def init_params(key, num_particles, num_actions):
    """Weights in (in_features, out_features) layout (transposed nn.Linear)."""
    in_dim = 6 * num_particles
    h = 200
    ks = jax.random.split(key, 6)

    def u(k, shape, fan_in):
        bound = 1.0 / jnp.sqrt(fan_in)
        return jax.random.uniform(k, shape, jnp.float32, -bound, bound)

    return {
        "w1": u(ks[0], (in_dim, h), in_dim), "b1": u(ks[1], (1, h), in_dim),
        "w2": u(ks[2], (h, h), h),           "b2": u(ks[3], (1, h), h),
        "w3": u(ks[4], (h, num_actions), h), "b3": u(ks[5], (1, num_actions), h),
    }


def dqn_reference(x, prepared):
    """Pure-JAX reference replicating the kernel's cast/pad scheme (f32 accumulation)."""
    f32 = jnp.float32
    wdt = prepared["w1"].dtype
    a = prepared["num_actions"]
    xq = x.astype(wdt).astype(f32)
    w1 = prepared["w1"].astype(f32)
    w2 = prepared["w2"].astype(f32)
    w3 = prepared["w3"].astype(f32)
    h1 = jax.nn.relu(xq @ w1 + prepared["b1"])
    h1 = h1.astype(wdt).astype(f32)
    h2 = jax.nn.relu(h1 @ w2 + prepared["b2"])
    h2 = h2.astype(wdt).astype(f32)
    out = h2 @ w3 + prepared["b3"]
    return out[:, :a]


if __name__ == "__main__":
    num_particles = 4            # -> input features = 6 * 4 = 24
    num_actions = 4
    batch = 2

    key = jax.random.PRNGKey(0)
    kx, kp = jax.random.split(key)
    x = jax.random.normal(kx, (batch, 6 * num_particles), jnp.float32)

    params = init_params(kp, num_particles, num_actions)
    prepared = prepare_params(params, weight_dtype=jnp.bfloat16)

    out = dqn_forward(x, prepared)
    out = jax.block_until_ready(out)

    ref = dqn_reference(x, prepared)
    assert out.shape == (batch, num_actions)
    assert jnp.allclose(out, ref, atol=1e-3, rtol=1e-3), (
        f"max abs err {jnp.max(jnp.abs(out - ref))}")

    print("KERNEL_OK")
</pallas_src>

<mosaic_0001>
module attributes {stable_mosaic.version = 11 : i64} {
  func.func @dqn_kernel(%arg0: i32, %arg1: memref<16x24xf32, #tpu.memory_space<vmem>>, %arg2: memref<24x256xbf16, #tpu.memory_space<vmem>>, %arg3: memref<1x256xf32, #tpu.memory_space<vmem>>, %arg4: memref<256x256xbf16, #tpu.memory_space<vmem>>, %arg5: memref<1x256xf32, #tpu.memory_space<vmem>>, %arg6: memref<256x128xbf16, #tpu.memory_space<vmem>>, %arg7: memref<1x128xf32, #tpu.memory_space<vmem>>, %arg8: memref<16x128xf32, #tpu.memory_space<vmem>>) attributes {dimension_semantics = [#tpu.dimension_semantics<parallel>], iteration_bounds = array<i64: 1>, scalar_prefetch = 0 : i64, scratch_operands = 0 : i64, tpu.core_type = #tpu.core_type<tc>, window_params = [{transform_indices = @transform_0, window_bounds = array<i64: 16, 24>}, {pipeline_mode = #tpu.pipeline_mode<synchronous>, transform_indices = @transform_1, window_bounds = array<i64: 24, 256>}, {pipeline_mode = #tpu.pipeline_mode<synchronous>, transform_indices = @transform_2, window_bounds = array<i64: 1, 256>}, {pipeline_mode = #tpu.pipeline_mode<synchronous>, transform_indices = @transform_3, window_bounds = array<i64: 256, 256>}, {pipeline_mode = #tpu.pipeline_mode<synchronous>, transform_indices = @transform_4, window_bounds = array<i64: 1, 256>}, {pipeline_mode = #tpu.pipeline_mode<synchronous>, transform_indices = @transform_5, window_bounds = array<i64: 256, 128>}, {pipeline_mode = #tpu.pipeline_mode<synchronous>, transform_indices = @transform_6, window_bounds = array<i64: 1, 128>}, {transform_indices = @transform_7, window_bounds = array<i64: 16, 128>}]} {
    %c0 = arith.constant 0 : index
    %c0_0 = arith.constant 0 : index
    %0 = vector.load %arg3[%c0, %c0_0] : memref<1x256xf32, #tpu.memory_space<vmem>>, vector<1x256xf32>
    %c0_1 = arith.constant 0 : index
    %c0_2 = arith.constant 0 : index
    %1 = vector.load %arg5[%c0_1, %c0_2] : memref<1x256xf32, #tpu.memory_space<vmem>>, vector<1x256xf32>
    %c0_3 = arith.constant 0 : index
    %c0_4 = arith.constant 0 : index
    %2 = vector.load %arg7[%c0_3, %c0_4] : memref<1x128xf32, #tpu.memory_space<vmem>>, vector<1x128xf32>
    %c0_5 = arith.constant 0 : index
    %c0_6 = arith.constant 0 : index
    %3 = vector.load %arg1[%c0_5, %c0_6] : memref<16x24xf32, #tpu.memory_space<vmem>>, vector<16x24xf32>
    %4 = arith.truncf %3 : vector<16x24xf32> to vector<16x24xbf16>
    %c0_7 = arith.constant 0 : index
    %c0_8 = arith.constant 0 : index
    %5 = vector.load %arg2[%c0_7, %c0_8] : memref<24x256xbf16, #tpu.memory_space<vmem>>, vector<24x256xbf16>
    %cst = arith.constant dense<0.000000e+00> : vector<16x256xf32>
    %6 = tpu.matmul %4, %5, %cst {dimension_numbers = #tpu.dot_dimension_numbers<[1], [0], [0], [1], [0, 0, 1, 1], [], []>} : vector<16x24xbf16>, vector<24x256xbf16>, vector<16x256xf32> -> vector<16x256xf32>
    %7 = vector.broadcast %0 : vector<1x256xf32> to vector<16x256xf32>
    %8 = arith.addf %6, %7 : vector<16x256xf32>
    %cst_9 = arith.constant 0.000000e+00 : f32
    %9 = vector.broadcast %cst_9 : f32 to vector<16x256xf32>
    %10 = arith.maximumf %8, %9 : vector<16x256xf32>
    %11 = arith.truncf %10 : vector<16x256xf32> to vector<16x256xbf16>
    %c0_10 = arith.constant 0 : index
    %c0_11 = arith.constant 0 : index
    %12 = vector.load %arg4[%c0_10, %c0_11] : memref<256x256xbf16, #tpu.memory_space<vmem>>, vector<256x256xbf16>
    %cst_12 = arith.constant dense<0.000000e+00> : vector<16x256xf32>
    %13 = tpu.matmul %11, %12, %cst_12 {dimension_numbers = #tpu.dot_dimension_numbers<[1], [0], [0], [1], [0, 0, 1, 1], [], []>} : vector<16x256xbf16>, vector<256x256xbf16>, vector<16x256xf32> -> vector<16x256xf32>
    %14 = vector.broadcast %1 : vector<1x256xf32> to vector<16x256xf32>
    %15 = arith.addf %13, %14 : vector<16x256xf32>
    %cst_13 = arith.constant 0.000000e+00 : f32
    %16 = vector.broadcast %cst_13 : f32 to vector<16x256xf32>
    %17 = arith.maximumf %15, %16 : vector<16x256xf32>
    %18 = arith.truncf %17 : vector<16x256xf32> to vector<16x256xbf16>
    %c0_14 = arith.constant 0 : index
    %c0_15 = arith.constant 0 : index
    %19 = vector.load %arg6[%c0_14, %c0_15] : memref<256x128xbf16, #tpu.memory_space<vmem>>, vector<256x128xbf16>
    %cst_16 = arith.constant dense<0.000000e+00> : vector<16x128xf32>
    %20 = tpu.matmul %18, %19, %cst_16 {dimension_numbers = #tpu.dot_dimension_numbers<[1], [0], [0], [1], [0, 0, 1, 1], [], []>} : vector<16x256xbf16>, vector<256x128xbf16>, vector<16x128xf32> -> vector<16x128xf32>
    %21 = vector.broadcast %2 : vector<1x128xf32> to vector<16x128xf32>
    %22 = arith.addf %20, %21 : vector<16x128xf32>
    %c0_17 = arith.constant 0 : index
    %c0_18 = arith.constant 0 : index
    %23 = vector.load %arg8[%c0_17, %c0_18] : memref<16x128xf32, #tpu.memory_space<vmem>>, vector<16x128xf32>
    tpu.vector_store %arg8[%c0_17, %c0_18], %22 {strides = array<i32>} : memref<16x128xf32, #tpu.memory_space<vmem>>, vector<16x128xf32>,
    return
  }
  func.func @transform_0(%arg0: i32) -> (i32, i32) {
    %c0_i32 = arith.constant 0 : i32
    %c0_i32_0 = arith.constant 0 : i32
    return %arg0, %c0_i32 : i32, i32
  }
  func.func @transform_1(%arg0: i32) -> (i32, i32) {
    %c0_i32 = arith.constant 0 : i32
    %c0_i32_0 = arith.constant 0 : i32
    %c0_i32_1 = arith.constant 0 : i32
    return %c0_i32, %c0_i32_0 : i32, i32
  }
  func.func @transform_2(%arg0: i32) -> (i32, i32) {
    %c0_i32 = arith.constant 0 : i32
    %c0_i32_0 = arith.constant 0 : i32
    %c0_i32_1 = arith.constant 0 : i32
    return %c0_i32, %c0_i32_0 : i32, i32
  }
  func.func @transform_3(%arg0: i32) -> (i32, i32) {
    %c0_i32 = arith.constant 0 : i32
    %c0_i32_0 = arith.constant 0 : i32
    %c0_i32_1 = arith.constant 0 : i32
    return %c0_i32, %c0_i32_0 : i32, i32
  }
  func.func @transform_4(%arg0: i32) -> (i32, i32) {
    %c0_i32 = arith.constant 0 : i32
    %c0_i32_0 = arith.constant 0 : i32
    %c0_i32_1 = arith.constant 0 : i32
    return %c0_i32, %c0_i32_0 : i32, i32
  }
  func.func @transform_5(%arg0: i32) -> (i32, i32) {
    %c0_i32 = arith.constant 0 : i32
    %c0_i32_0 = arith.constant 0 : i32
    %c0_i32_1 = arith.constant 0 : i32
    return %c0_i32, %c0_i32_0 : i32, i32
  }
  func.func @transform_6(%arg0: i32) -> (i32, i32) {
    %c0_i32 = arith.constant 0 : i32
    %c0_i32_0 = arith.constant 0 : i32
    %c0_i32_1 = arith.constant 0 : i32
    return %c0_i32, %c0_i32_0 : i32, i32
  }
  func.func @transform_7(%arg0: i32) -> (i32, i32) {
    %c0_i32 = arith.constant 0 : i32
    %c0_i32_0 = arith.constant 0 : i32
    return %arg0, %c0_i32 : i32, i32
  }
}

</mosaic_0001>

<bundles_post_ra>
// kernel: tpu_custom_call.1
= control target key start
LH: loop header
LB: loop body
LE: loop exit
PB: predicated region body
PF: predicated region fallthrough
CT: control target
= control target key end

     0   :  { %12 = vsyncpa [#allocation3], 0  ;;  %s1045_s0 = inlined_call_operand.hbm [shape: f32[16,24], index: 0, kind: input, shape index: {}]   ;;  %s1046_s1 = inlined_call_operand.hbm [shape: bf16[24,256], index: 1, kind: input, shape index: {}]   ;;  %s1047_s2 = inlined_call_operand.vmem [shape: f32[1,256], index: 2, kind: input, shape index: {}]   ;;  %s1048_s3 = inlined_call_operand.hbm [shape: bf16[256,256], index: 3, kind: input, shape index: {}]   ;;  %s1049_s4 = inlined_call_operand.vmem [shape: f32[1,256], index: 4, kind: input, shape index: {}]   ;;  %s1050_s5 = inlined_call_operand.hbm [shape: bf16[256,128], index: 5, kind: input, shape index: {}]   ;;  %s1051_s6 = inlined_call_operand.vmem [shape: f32[1,128], index: 6, kind: input, shape index: {}]   ;;  %s1052_s7 = inlined_call_operand.hbm [shape: f32[16,128], index: 7, kind: output, shape index: {}]  }
   0x1   :  { %13 = vsyncpa [#allocation6], 0 }
   0x2   :  { %14 = vsyncpa [#allocation9], 0 }
   0x3   :  { %15 = vsyncpa [#allocation4], 0  ;;  %s900_s24 = smov [#allocation5]   ;;  %s901_s26 = smov [#allocation2]  }
   0x4   :  { %s33_s25 = sshll.u32 %s900_s24, 4  ;;  %s21_s27 = sshll.u32 %s901_s26, 4  ;;  %s34_s25 = int_to_ptr.vmem [resolvable:$true] %s33_s25  ;;  %s950_s27 = int_to_ptr.vmem [resolvable:$true] %s21_s27 }
   0x5   :  { %s782_s30 = scalar_lea.hbm %s1046_s1, 384 }
   0x6   :  { %p783_p0 = scmp.ne.s32.totalorder %s1046_s1, %s782_s30  ;;  %p786_p1 = scmp.lt.u32.totalorder %s782_s30, %s1046_s1 }
   0x8   :  { %p788_p2 = pnand %p786_p1, %p783_p0 }
   0xa   :  { %791 = shalt.err (!%p788_p2)
}
   0xb   :  { %s792_s12 = scalar_lea.vmem %s34_s25, 384  ;;  %p797_p4 = scmp.lt.s32.totalorder %s34_s25, %s34_s25 }
   0xc   :  { %p793_p3 = scmp.ne.s32.totalorder %s34_s25, %s792_s12  ;;  %p798_p5 = scmp.lt.s32.totalorder %s792_s12, %s792_s12 }
   0xe   :  { %p799_p6 = por %p798_p5, %p797_p4 }
  0x10   :  { %p800_p7 = pnand %p799_p6, %p793_p3 }
  0x12   :  { %803 = shalt.err (!%p800_p7)
}
  0x13   :  { %s902_s13 = smov 128   ;;  %s903_s14 = smov 8  }
  0x14   :  { %39 = dma.hbm_to_vmem [thread:$0]  %s1046_s1, 384, %s34_s25, [#allocation6], %s902_s13, %s902_s13, %s903_s14  }
  0x15   :  { %s804_s19 = scalar_lea.hbm %s1045_s0, 256 }
  0x16   :  { %p805_p8 = scmp.ne.s32.totalorder %s1045_s0, %s804_s19  ;;  %p808_p9 = scmp.lt.u32.totalorder %s804_s19, %s1045_s0 }
  0x18   :  { %p810_p10 = pnand %p808_p9, %p805_p8 }
  0x1a   :  { %813 = shalt.err (!%p810_p10)
}
  0x1b   :  { %s814_s24 = scalar_lea.vmem %s950_s27, 256  ;;  %p819_p12 = scmp.lt.s32.totalorder %s950_s27, %s950_s27 }
  0x1c   :  { %p815_p11 = scmp.ne.s32.totalorder %s950_s27, %s814_s24  ;;  %p820_p13 = scmp.lt.s32.totalorder %s814_s24, %s814_s24 }
  0x1e   :  { %p821_p0 = por %p820_p13, %p819_p12 }
  0x20   :  { %p822_p1 = pnand %p821_p0, %p815_p11 }
  0x22   :  { %825 = shalt.err (!%p822_p1)
}
  0x23   :  { %27 = dma.hbm_to_vmem [thread:$0]  %s1045_s0, 256, %s950_s27, [#allocation3], %s902_s13, %s902_s13, %s903_s14  }
  0x24   :  { %s904_s26 = smov [#allocation7]   ;;  %s905_s29 = smov [#allocation8]  }
  0x25   :  { %s47_s28 = sshll.u32 %s904_s26, 4  ;;  %s61_s30 = sshll.u32 %s905_s29, 4  ;;  %s48_s28 = int_to_ptr.vmem [resolvable:$true] %s47_s28  ;;  %s987_s30 = int_to_ptr.vmem [resolvable:$true] %s61_s30 }
  0x26   :  { %s826_s10 = scalar_lea.hbm %s1048_s3, 4096 }
  0x27   :  { %p827_p2 = scmp.ne.s32.totalorder %s1048_s3, %s826_s10  ;;  %p830_p3 = scmp.lt.u32.totalorder %s826_s10, %s1048_s3 }
  0x29   :  { %p832_p4 = pnand %p830_p3, %p827_p2 }
  0x2b   :  { %835 = shalt.err (!%p832_p4)
}
  0x2c   :  { %s836_s0 = scalar_lea.vmem %s48_s28, 4096  ;;  %p841_p6 = scmp.lt.s32.totalorder %s48_s28, %s48_s28 }
  0x2d   :  { %p837_p5 = scmp.ne.s32.totalorder %s48_s28, %s836_s0  ;;  %p842_p7 = scmp.lt.s32.totalorder %s836_s0, %s836_s0 }
  0x2f   :  { %p843_p8 = por %p842_p7, %p841_p6 }
  0x31   :  { %p844_p9 = pnand %p843_p8, %p837_p5 }
  0x33   :  { %847 = shalt.err (!%p844_p9)
}
  0x34   :  { %53 = dma.hbm_to_vmem [thread:$0]  %s1048_s3, 4096, %s48_s28, [#allocation6], %s902_s13, %s902_s13, %s903_s14  }
  0x35   :  { %s848_s20 = scalar_lea.hbm %s1050_s5, 2048 }
  0x36   :  { %p849_p10 = scmp.ne.s32.totalorder %s1050_s5, %s848_s20  ;;  %p852_p11 = scmp.lt.u32.totalorder %s848_s20, %s1050_s5 }
  0x38   :  { %p854_p12 = pnand %p852_p11, %p849_p10 }
  0x3a   :  { %857 = shalt.err (!%p854_p12)
}
  0x3b   :  { %s858_s1 = scalar_lea.vmem %s987_s30, 2048  ;;  %p863_p0 = scmp.lt.s32.totalorder %s987_s30, %s987_s30 }
  0x3c   :  { %p859_p13 = scmp.ne.s32.totalorder %s987_s30, %s858_s1  ;;  %p864_p1 = scmp.lt.s32.totalorder %s858_s1, %s858_s1 }
  0x3e   :  { %p865_p2 = por %p864_p1, %p863_p0 }
  0x40   :  { %p866_p3 = pnand %p865_p2, %p859_p13 }
  0x42   :  { %869 = shalt.err (!%p866_p3)
}
  0x43   :  { %s906_s3 = smov 64   ;;  %s907_s25 = smov 4  }
  0x44   :  { %67 = dma.hbm_to_vmem [thread:$0]  %s1050_s5, 2048, %s987_s30, [#allocation9], %s906_s3, %s906_s3, %s907_s25  }
  0x45   :  { %892 = dma.done.wait [#allocation3], 256  }
  0x46   :  { %893 = vsyncadd [#allocation3], 4294967040 }
  0x47   :  { %894 = dma.done.wait [#allocation6], 4480  }
  0x48   :  { %895 = vsyncadd [#allocation6], 4294962816 }
  0x49   :  { %896 = dma.done.wait [#allocation9], 2048  }
  0x4a   :  { %897 = vsyncadd [#allocation9], 4294965248  ;;  %v908_v0 = vmov 0   ;;  %v713_v1 = vld [vmem:[#allocation5 + $0x4] ss:$8 sps:$4 sm:$0xff]   ;;  %v91_v3 = vld [vmem:[#allocation5 + $0x10] sm:$0xff]  ;;  %v93_v53 = vlaneseq }
  0x4b   :  { %161 = vmatprep.mubr.bf16.mxu0 %v908_v0  ;;  %v715_v2 = vld [vmem:[#allocation5] ss:$8 sps:$4 sm:$0xff]   ;;  %vm122_vm0 = vcmask 1043456   ;;  %v86_v4 = vld [vmem:[#allocation2] sm:$0xff]  ;;  %129 = vmatprep.subr.bf16.mxu0 %v713_v1  ;;  %v629_v5 = vcombine.high %v91_v3, %v91_v3  ;;  %v628_v6 = vcombine.low %v91_v3, %v91_v3  ;;  %v87_v7 = vld [vmem:[#allocation2 + $0x8] sm:$0xff]  ;;  %vm118_vm1 = vcmask 195584  }
  0x4c   :  { %130 = vmatpush1.bf16.msra.mxu0 %v715_v2  ;;  %v718_v8 = vld [vmem:[#allocation7 + $0x4] ss:$8 sps:$4 sm:$0xff]   ;;  %v720_v9 = vld [vmem:[#allocation7] ss:$8 sps:$4 sm:$0xff]   ;;  %v721_v11 = vld [vmem:[#allocation7 + $0x14] ss:$8 sps:$4 sm:$0xff]   ;;  %v88_v12 = vpack.c.bf16 %v87_v7, %v86_v4 }
  0x4d   :  { %630 = vmatprep.subr.msk.bf16.mxu0 %vm122_vm0, %v629_v5  ;;  %v124_v10 = vsel %vm122_vm0, %v628_v6, 0  ;;  %381 = vmatprep.subr.bf16.mxu1 %v718_v8  ;;  %v723_v13 = vld [vmem:[#allocation7 + $0x10] ss:$8 sps:$4 sm:$0xff]   ;;  %v724_v14 = vld [vmem:[#allocation7 + $0x24] ss:$8 sps:$4 sm:$0xff]   ;;  %v94_v54 = vshrl.u32 %v93_v53, 7 }
  0x4e   :  { %382 = vmatpush1.bf16.msra.mxu1 %v720_v9  ;;  %v726_v15 = vld [vmem:[#allocation7 + $0x20] ss:$8 sps:$4 sm:$0xff]   ;;  %v727_v16 = vld [vmem:[#allocation7 + $0x34] ss:$8 sps:$4 sm:$0xff]   ;;  %v729_v17 = vld [vmem:[#allocation7 + $0x30] ss:$8 sps:$4 sm:$0xff]  }
  0x4f   :  { %383 = vmatprep.subr.bf16.mxu1 %v721_v11  ;;  %v730_v18 = vld [vmem:[#allocation7 + $0x44] ss:$8 sps:$4 sm:$0xff]   ;;  %v732_v19 = vld [vmem:[#allocation7 + $0x40] ss:$8 sps:$4 sm:$0xff]   ;;  %v733_v20 = vld [vmem:[#allocation7 + $0x54] ss:$8 sps:$4 sm:$0xff]  }
  0x50   :  { %132 = vmatpush1.bf16.msra.mxu0 %v124_v10  ;;  %v735_v21 = vld [vmem:[#allocation7 + $0x50] ss:$8 sps:$4 sm:$0xff]   ;;  %v736_v22 = vld [vmem:[#allocation7 + $0x64] ss:$8 sps:$4 sm:$0xff]   ;;  %v738_v23 = vld [vmem:[#allocation7 + $0x60] ss:$8 sps:$4 sm:$0xff]  }
  0x51   :  { %v739_v24 = vld [vmem:[#allocation7 + $0x74] ss:$8 sps:$4 sm:$0xff]   ;;  %v741_v25 = vld [vmem:[#allocation7 + $0x70] ss:$8 sps:$4 sm:$0xff]   ;;  %v742_v26 = vld [vmem:[#allocation7 + $0x84] ss:$8 sps:$4 sm:$0xff]  }
  0x52   :  { %384 = vmatpush1.bf16.msra.mxu1 %v723_v13  ;;  %v744_v27 = vld [vmem:[#allocation7 + $0x80] ss:$8 sps:$4 sm:$0xff]   ;;  %v745_v28 = vld [vmem:[#allocation7 + $0x94] ss:$8 sps:$4 sm:$0xff]   ;;  %v747_v29 = vld [vmem:[#allocation7 + $0x90] ss:$8 sps:$4 sm:$0xff]  }
  0x53   :  { %631 = vmatmul.mubr.msk.bf16.vlgmr.msra.gmra.mrb[0].mxu0 %vm118_vm1, %v88_v12  ;;  %385 = vmatprep.subr.bf16.mxu1 %v724_v14  ;;  %v748_v30 = vld [vmem:[#allocation7 + $0xa4] ss:$8 sps:$4 sm:$0xff]   ;;  %v750_v31 = vld [vmem:[#allocation7 + $0xa0] ss:$8 sps:$4 sm:$0xff]   ;;  %v751_v32 = vld [vmem:[#allocation7 + $0xb4] ss:$8 sps:$4 sm:$0xff]  }
  0x54   :  { %v753_v33 = vld [vmem:[#allocation7 + $0xb0] ss:$8 sps:$4 sm:$0xff]   ;;  %v754_v34 = vld [vmem:[#allocation7 + $0xc4] ss:$8 sps:$4 sm:$0xff]   ;;  %v756_v35 = vld [vmem:[#allocation7 + $0xc0] ss:$8 sps:$4 sm:$0xff]  }
  0x55   :  { %v757_v36 = vld [vmem:[#allocation7 + $0xd4] ss:$8 sps:$4 sm:$0xff]   ;;  %v759_v37 = vld [vmem:[#allocation7 + $0xd0] ss:$8 sps:$4 sm:$0xff]   ;;  %v760_v38 = vld [vmem:[#allocation7 + $0xe4] ss:$8 sps:$4 sm:$0xff]  }
  0x56   :  { %386 = vmatpush1.bf16.msra.mxu1 %v726_v15  ;;  %v762_v39 = vld [vmem:[#allocation7 + $0xe0] ss:$8 sps:$4 sm:$0xff]   ;;  %v763_v40 = vld [vmem:[#allocation7 + $0xf4] ss:$8 sps:$4 sm:$0xff]   ;;  %v765_v41 = vld [vmem:[#allocation7 + $0xf0] ss:$8 sps:$4 sm:$0xff]  }
  0x57   :  { %387 = vmatprep.subr.bf16.mxu1 %v727_v16  ;;  %v766_v42 = vld [vmem:[#allocation8 + $0x40] sm:$0xff]   ;;  %v768_v44 = vld [vmem:[#allocation8 + $0x48] sm:$0xff]   ;;  %v770_v46 = vld [vmem:[#allocation8 + $0x50] sm:$0xff]   ;;  %v95_v55 = vsub.s32 0, %v94_v54  ;;  %v99_v57 = vsub.s32 1, %v94_v54  ;;  %s909_s9 = smov [#allocation10]  }
  0x58   :  { %v767_v43 = vld [vmem:[#allocation8] sm:$0xff]   ;;  %681 = vmatprep.subr.bf16.mxu0 %v766_v42  ;;  %v769_v45 = vld [vmem:[#allocation8 + $0x8] sm:$0xff]   ;;  %v771_v47 = vld [vmem:[#allocation8 + $0x10] sm:$0xff]   ;;  %s612_s10 = sshll.u32 %s909_s9, 4  ;;  %s613_s10 = int_to_ptr.vmem [resolvable:$true] %s612_s10 }
  0x59   :  { %682 = vmatpush3.bf16.msra.mxu0 %v767_v43  ;;  %v772_v48 = vld [vmem:[#allocation8 + $0x58] sm:$0xff]   ;;  %v774_v50 = vld [vmem:[#allocation8 + $0x60] sm:$0xff]   ;;  %v776_v52 = vld [vmem:[#allocation8 + $0x68] sm:$0xff]   ;;  %s870_s11 = scalar_lea.vmem %s613_s10, 256  ;;  %p875_p5 = scmp.lt.s32.totalorder %s613_s10, %s613_s10 }
  0x5a   :  { %388 = vmatpush1.bf16.msra.mxu1 %v729_v17  ;;  %683 = vmatprep.subr.bf16.mxu0 %v768_v44  ;;  %v773_v49 = vld [vmem:[#allocation8 + $0x18] sm:$0xff]   ;;  %v775_v51 = vld [vmem:[#allocation8 + $0x20] sm:$0xff]   ;;  %v777_v10 = vld [vmem:[#allocation8 + $0x28] sm:$0xff]   ;;  %p871_p4 = scmp.ne.s32.totalorder %s613_s10, %s870_s11  ;;  %p876_p6 = scmp.lt.s32.totalorder %s870_s11, %s870_s11 }
  0x5b   :  { %389 = vmatprep.subr.bf16.mxu1 %v730_v18  ;;  %v83_v56 = vld [vmem:[%s1047_s2] sm:$0x3]  ;;  %v778_v11 = vld [vmem:[#allocation8 + $0x70] sm:$0xff]  }
  0x5c   :  { %v96_v58 = vrot.slane %v83_v56, %v95_v55  ;;  %v100_v59 = vrot.slane %v83_v56, %v99_v57  ;;  %v779_v12 = vld [vmem:[#allocation8 + $0x30] sm:$0xff]   ;;  %v780_v13 = vld [vmem:[#allocation8 + $0x78] sm:$0xff]   ;;  %p877_p7 = por %p876_p6, %p875_p5 }
  0x5d   :  { %684 = vmatpush3.bf16.msra.mxu0 %v769_v45  ;;  %v781_v14 = vld [vmem:[#allocation8 + $0x38] sm:$0xff]  }
  0x5e   :  { %390 = vmatpush1.bf16.msra.mxu1 %v732_v19  ;;  %685 = vmatprep.subr.bf16.mxu0 %v770_v46  ;;  %v84_v15 = vld [vmem:[%s1049_s4] sm:$0x3]  ;;  %p878_p8 = pnand %p877_p7, %p871_p4 }
  0x5f   :  { %391 = vmatprep.subr.bf16.mxu1 %v733_v20  ;;  %v214_v16 = vrot.slane %v84_v15, %v95_v55  ;;  %v218_v17 = vrot.slane %v84_v15, %v99_v57 }
  0x61   :  { %686 = vmatpush3.bf16.msra.mxu0 %v771_v47 }
  0x62   :  { %392 = vmatpush1.bf16.msra.mxu1 %v735_v21  ;;  %687 = vmatprep.subr.bf16.mxu0 %v772_v48 }
  0x63   :  { %393 = vmatprep.subr.bf16.mxu1 %v736_v22 }
  0x65   :  { %688 = vmatpush3.bf16.msra.mxu0 %v773_v49 }
  0x66   :  { %394 = vmatpush1.bf16.msra.mxu1 %v738_v23  ;;  %689 = vmatprep.subr.bf16.mxu0 %v774_v50 }
  0x67   :  { %395 = vmatprep.subr.bf16.mxu1 %v739_v24 }
  0x69   :  { %690 = vmatpush3.bf16.msra.mxu0 %v775_v51 }
  0x6a   :  { %396 = vmatpush1.bf16.msra.mxu1 %v741_v25  ;;  %691 = vmatprep.subr.bf16.mxu0 %v776_v52 }
  0x6b   :  { %397 = vmatprep.subr.bf16.mxu1 %v742_v26 }
  0x6d   :  { %692 = vmatpush3.bf16.msra.mxu0 %v777_v10 }
  0x6e   :  { %398 = vmatpush1.bf16.msra.mxu1 %v744_v27  ;;  %693 = vmatprep.subr.bf16.mxu0 %v778_v11 }
  0x6f   :  { %399 = vmatprep.subr.bf16.mxu1 %v745_v28 }
  0x71   :  { %694 = vmatpush3.bf16.msra.mxu0 %v779_v12 }
  0x72   :  { %400 = vmatpush1.bf16.msra.mxu1 %v747_v29  ;;  %695 = vmatprep.subr.bf16.mxu0 %v780_v13 }
  0x73   :  { %401 = vmatprep.subr.bf16.mxu1 %v748_v30 }
  0x75   :  { %696 = vmatpush3.bf16.msra.mxu0 %v781_v14 }
  0x76   :  { %402 = vmatpush1.bf16.msra.mxu1 %v750_v31 }
  0x77   :  { %403 = vmatprep.subr.bf16.mxu1 %v751_v32 }
  0x7a   :  { %404 = vmatpush1.bf16.msra.mxu1 %v753_v33  ;;  %v664_v33 = vld [vmem:[%s1051_s6] ss:$0 sm:$0xff] }
  0x7b   :  { %405 = vmatprep.subr.bf16.mxu1 %v754_v34 }
  0x7e   :  { %406 = vmatpush1.bf16.msra.mxu1 %v756_v35 }
  0x7f   :  { %407 = vmatprep.subr.bf16.mxu1 %v757_v36 }
  0x82   :  { %408 = vmatpush1.bf16.msra.mxu1 %v759_v37 }
  0x83   :  { %409 = vmatprep.subr.bf16.mxu1 %v760_v38 }
  0x86   :  { %410 = vmatpush1.bf16.msra.mxu1 %v762_v39 }
  0x87   :  { %411 = vmatprep.subr.bf16.mxu1 %v763_v40 }
  0x8a   :  { %412 = vmatpush1.bf16.msra.mxu1 %v765_v41 }
 0x126   :  { %v163_v60 = vpop.f32.mrb[0].mxu0 }
 0x127   :  { %v164_v61 = vadd.f32 %v163_v60, %v96_v58  ;;  %v165_v62 = vpop.f32.mrb[1].mxu0 }
 0x128   :  { %v166_v63 = vadd.f32 %v165_v62, %v100_v59  ;;  %v167_v0 = vpop.f32.mrb[2].mxu0 }
 0x129   :  { %v168_v1 = vadd.f32 %v167_v0, %v96_v58  ;;  %v169_v2 = vpop.f32.mrb[3].mxu0  ;;  %v172_v4 = vmax.f32 %v164_v61, 0.0 }
 0x12a   :  { %v170_v3 = vadd.f32 %v169_v2, %v100_v59  ;;  %v173_v6 = vmax.f32 %v166_v63, 0.0 }
 0x12b   :  { %v174_v5 = vmax.f32 %v168_v1, 0.0 }
 0x12c   :  { %v175_v7 = vmax.f32 %v170_v3, 0.0 }
 0x12d   :  { %v176_v8 = vpack.c.bf16 %v174_v5, %v172_v4 }
 0x12e   :  { %v177_v9 = vpack.c.bf16 %v175_v7, %v173_v6 }
 0x130   :  { %413 = vmatprep.mubr.bf16.mxu1 %v177_v9 }
 0x131   :  { %414 = vmatmul.mubr.bf16.vlgmr.msra.gmra.mrb[0].mxu1 %v176_v8 }
 0x204   :  { %v415_v18 = vpop.f32.mrb[0].mxu1 }
 0x205   :  { %v416_v19 = vadd.f32 %v415_v18, %v214_v16  ;;  %v417_v20 = vpop.f32.mrb[1].mxu1 }
 0x206   :  { %v418_v21 = vadd.f32 %v417_v20, %v218_v17  ;;  %v419_v22 = vpop.f32.mrb[2].mxu1 }
 0x207   :  { %v420_v23 = vadd.f32 %v419_v22, %v214_v16  ;;  %v421_v24 = vpop.f32.mrb[3].mxu1  ;;  %v424_v26 = vmax.f32 %v416_v19, 0.0 }
 0x208   :  { %v422_v25 = vadd.f32 %v421_v24, %v218_v17  ;;  %v425_v28 = vmax.f32 %v418_v21, 0.0 }
 0x209   :  { %v426_v27 = vmax.f32 %v420_v23, 0.0 }
 0x20a   :  { %v427_v29 = vmax.f32 %v422_v25, 0.0 }
 0x20b   :  { %v428_v30 = vpack.c.bf16 %v426_v27, %v424_v26 }
 0x20c   :  { %v429_v31 = vpack.c.bf16 %v427_v29, %v425_v28 }
 0x20e   :  { %596 = vmatprep.mubr.bf16.mxu0 %v429_v31 }
 0x20f   :  { %597 = vmatmul.mubr.bf16.vlgmr.msra.gmra.mrb[4].mxu0 %v428_v30 }
 0x2e2   :  { %v697_v32 = vpop.f32.mrb[4].mxu0 }
 0x2e3   :  { %v698_v34 = vpop.f32.mrb[5].mxu0 }
 0x2e4   :  { %v699_v35 = vadd.f32 %v698_v34, %v697_v32  ;;  %v700_v36 = vpop.f32.mrb[6].mxu0 }
 0x2e5   :  { %v701_v37 = vpop.f32.mrb[7].mxu0 }
 0x2e6   :  { %v599_v38 = vadd.f32 %v699_v35, %v664_v33  ;;  %v702_v39 = vadd.f32 %v701_v37, %v700_v36 }
 0x2e8   :  { %605 = vst [vmem:[#allocation10] sm:$0xff] %v599_v38  ;;  %v602_v40 = vadd.f32 %v702_v39, %v664_v33 }
 0x2ea   :  { %606 = vst [vmem:[#allocation10 + $0x8] sm:$0xff] %v602_v40 }
 0x2eb   :  { %881 = shalt.err (!%p878_p8)
}
 0x2ec   :  { %s882_s15 = scalar_lea.hbm %s1052_s7, 256 }
 0x2ed   :  { %p883_p9 = scmp.ne.s32.totalorder %s1052_s7, %s882_s15  ;;  %p886_p10 = scmp.lt.u32.totalorder %s882_s15, %s1052_s7 }
 0x2ef   :  { %p888_p11 = pnand %p886_p10, %p883_p9 }
 0x2f1   :  { %891 = shalt.err (!%p888_p11)
}
 0x2f2   :  { %618 = dma.vmem_to_hbm [thread:$0]  %s613_s10, 256, %s1052_s7, [#allocation4], %s902_s13, %s902_s13, %s903_s14  }
 0x2f3   :  { %898 = dma.done.wait [#allocation4], 256  }
 0x2f4   :  { %899 = vsyncadd [#allocation4], 4294967040 }
 0x2f5   :  { %622 = vsyncpa [#allocation3], 1 }
 0x2f6   :  { %623 = vsyncpa [#allocation6], 1 }
 0x2f7   :  { %624 = vsyncpa [#allocation9], 1 }
 0x2f8   :  { %625 = vsyncpa [#allocation4], 1 }

</bundles_post_ra>
